<compile_context>
chip_gen: v7x
topology: tpu7x:2x2x1
jax: 0.10.0
libtpu: 0.0.40
codegen_flags: <defaults>
</compile_context>

<pallas_src>
import jax
import jax.numpy as jnp
from jax import lax
from jax.experimental import pallas as pl
from jax.experimental.pallas import tpu as pltpu  # noqa: F401  (TPU backend)

# ---------------- problem sizes (small, deterministic) ----------------
B = 2        # logical batch (n parallel envs)
D_R = 7      # robot node feature dim
N_H = 5      # number of humans (spatial edges)
D_H = 4      # per-human feature dim
H = 32       # hidden size (= base.output_size = recurrent_hidden_state_size)
A = 5        # Discrete action_space.n

# padded / packed sizes
B_P = 8            # batch padded to a full sublane group
D_RP = 8           # robot features padded to 8
D_HP = 8           # human features padded to 8
OBS_W = 48         # obs slab lanes: [0:8 robot | 8:40 hxs | 40:41 mask | pad]
OUT_W = 128        # lane-dense output slab width


def _policy_act_kernel(obs_ref, human_ref, w_emb_ref, w_stack_ref,
                       w_head_ref, bias_ref, out_ref):
    f32 = jnp.float32

    robot = obs_ref[:, 0:D_RP]                        # (B_P, 8)
    hxs = obs_ref[:, D_RP:D_RP + H]                   # (B_P, H)
    masks = obs_ref[:, D_RP + H:D_RP + H + 1]         # (B_P, 1)

    # ---- embeddings: one matmul for the robot, ONE matmul for all humans ----
    w_r = w_emb_ref[0:D_RP, :]                        # (8, H)
    w_h = w_emb_ref[D_RP:2 * D_RP, :]                 # (8, H)
    b_r = bias_ref[0:1, :]
    b_h = bias_ref[1:2, :]

    r_emb = jnp.maximum(
        jnp.dot(robot, w_r, preferred_element_type=f32) + b_r, 0.0)          # (B_P, H)
    h_emb_flat = jnp.maximum(
        jnp.dot(human_ref[...], w_h, preferred_element_type=f32) + b_h, 0.0)  # (N_H*B_P, H)
    # human-major layout: leading-dim split exactly at (8-row) tile boundaries
    h_emb = h_emb_flat.reshape(N_H, B_P, H)                                   # (N_H, B_P, H)

    # ---- softmax attention over humans (humans live on the leading axis) ----
    w_att = w_stack_ref[0:H, :]
    r_att = jnp.dot(r_emb, w_att, preferred_element_type=f32)                 # (B_P, H)
    inv_sqrt_h = 1.0 / (H ** 0.5)
    scores = jnp.sum(h_emb * r_att[None, :, :], axis=-1,
                     keepdims=True) * inv_sqrt_h                              # (N_H, B_P, 1)
    s_max = jnp.max(scores, axis=0, keepdims=True)
    s_exp = jnp.exp(scores - s_max)
    s_sum = jnp.sum(s_exp, axis=0, keepdims=True)
    attn = s_exp * pl.reciprocal(s_sum, approx=True)                          # (N_H, B_P, 1)

    # attention-weighted human context
    weighted = jnp.sum(attn * h_emb, axis=0)                                  # (B_P, H)

    # ---- fuse robot + context: two (H,H) matmuls, no lane-axis concat ----
    w_x_r = w_stack_ref[H:2 * H, :]
    w_x_w = w_stack_ref[2 * H:3 * H, :]
    b_x = bias_ref[2:3, :]
    x = jnp.maximum(
        jnp.dot(r_emb, w_x_r, preferred_element_type=f32)
        + jnp.dot(weighted, w_x_w, preferred_element_type=f32) + b_x, 0.0)    # (B_P, H)

    # ---- mask-gated GRU cell with per-gate (H,H) weights (no lane slicing) ----
    h_prev = hxs * masks
    w_ir = w_stack_ref[3 * H:4 * H, :]
    w_iz = w_stack_ref[4 * H:5 * H, :]
    w_in = w_stack_ref[5 * H:6 * H, :]
    w_hr = w_stack_ref[6 * H:7 * H, :]
    w_hz = w_stack_ref[7 * H:8 * H, :]
    w_hn = w_stack_ref[8 * H:9 * H, :]
    b_ir = bias_ref[3:4, :]
    b_iz = bias_ref[4:5, :]
    b_in = bias_ref[5:6, :]
    b_hr = bias_ref[6:7, :]
    b_hz = bias_ref[7:8, :]
    b_hn = bias_ref[8:9, :]

    r_gate = jax.nn.sigmoid(
        jnp.dot(x, w_ir, preferred_element_type=f32) + b_ir
        + jnp.dot(h_prev, w_hr, preferred_element_type=f32) + b_hr)
    z_gate = jax.nn.sigmoid(
        jnp.dot(x, w_iz, preferred_element_type=f32) + b_iz
        + jnp.dot(h_prev, w_hz, preferred_element_type=f32) + b_hz)
    n_gate = jnp.tanh(
        jnp.dot(x, w_in, preferred_element_type=f32) + b_in
        + r_gate * (jnp.dot(h_prev, w_hn, preferred_element_type=f32) + b_hn))
    h_new = (1.0 - z_gate) * n_gate + z_gate * h_prev                         # (B_P, H)

    # ---- fused critic/actor head: lanes [0:A) = logits, lane A = value ----
    head = (jnp.dot(h_new, w_head_ref[...], preferred_element_type=f32)
            + bias_ref[9:10, 0:8])                                            # (B_P, 8)
    logits = head[:, 0:A]                                                     # (B_P, A)
    value = head[:, A:A + 1]                                                  # (B_P, 1)

    # Categorical: mode(), log_probs(mode), entropy()
    l_max = jnp.max(logits, axis=-1, keepdims=True)
    shifted = logits - l_max
    lse = jnp.log(jnp.sum(jnp.exp(shifted), axis=-1, keepdims=True))
    log_probs = shifted - lse
    probs = jnp.exp(log_probs)

    col = lax.broadcasted_iota(jnp.int32, (B_P, A), 1)
    is_max = logits >= l_max
    action = jnp.min(jnp.where(is_max, col, A), axis=-1, keepdims=True)       # (B_P, 1) i32

    onehot = (col == action).astype(f32)
    logp = jnp.sum(log_probs * onehot, axis=-1, keepdims=True)                # (B_P, 1)
    ent = -jnp.sum(probs * log_probs, axis=-1, keepdims=True)                 # (B_P, 1)

    # ---- single lane-dense output slab (one writeback DMA) ----
    out_ref[...] = jnp.zeros_like(out_ref)
    out_ref[:, 0:1] = value
    out_ref[:, 1:2] = action.astype(f32)
    out_ref[:, 2:3] = logp
    out_ref[:, 3:4] = ent                       # per-row entropy; mean taken in wrapper
    for n in range(N_H):                        # attention weights, lanes 8..8+N_H
        out_ref[:, 8 + n:9 + n] = attn[n]
    out_ref[:, 16:16 + H] = h_new               # new rnn hidden state, lanes 16..48


def init_params(key):
    """Deterministic synthetic parameters (per-gate GRU, split fusion weights)."""
    ks = jax.random.split(key, 13)
    nrm = lambda k, shape, scale: (scale * jax.random.normal(k, shape)).astype(jnp.float32)
    z = lambda n: jnp.zeros((n,), jnp.float32)
    return {
        "w_r": nrm(ks[0], (D_R, H), 0.3), "b_r": z(H),
        "w_h": nrm(ks[1], (D_H, H), 0.3), "b_h": z(H),
        "w_att": nrm(ks[2], (H, H), 0.15),
        "w_x_r": nrm(ks[3], (H, H), 0.15),
        "w_x_w": nrm(ks[4], (H, H), 0.15),
        "b_x": z(H),
        "w_ir": nrm(ks[5], (H, H), 0.15), "b_ir": z(H),
        "w_iz": nrm(ks[6], (H, H), 0.15), "b_iz": z(H),
        "w_in": nrm(ks[7], (H, H), 0.15), "b_in": z(H),
        "w_hr": nrm(ks[8], (H, H), 0.15), "b_hr": z(H),
        "w_hz": nrm(ks[9], (H, H), 0.15), "b_hz": z(H),
        "w_hn": nrm(ks[10], (H, H), 0.15), "b_hn": z(H),
        "w_v": nrm(ks[11], (H, 1), 0.3), "b_v": z(1),
        "w_a": nrm(ks[12], (H, A), 0.1), "b_a": z(A),
    }


def pack_params(p):
    """Pack 25 small tensors into 4 DMA-friendly blobs (done once, outside the kernel)."""
    f32 = jnp.float32
    w_emb = jnp.zeros((2 * D_RP, H), f32)
    w_emb = w_emb.at[0:D_R, :].set(p["w_r"])
    w_emb = w_emb.at[D_RP:D_RP + D_H, :].set(p["w_h"])

    w_stack = jnp.concatenate(
        [p["w_att"], p["w_x_r"], p["w_x_w"],
         p["w_ir"], p["w_iz"], p["w_in"],
         p["w_hr"], p["w_hz"], p["w_hn"]], axis=0).astype(f32)   # (9H, H)

    w_head = jnp.zeros((H, 8), f32)
    w_head = w_head.at[:, 0:A].set(p["w_a"])
    w_head = w_head.at[:, A:A + 1].set(p["w_v"])

    biases = jnp.zeros((16, H), f32)
    for i, name in enumerate(
            ["b_r", "b_h", "b_x", "b_ir", "b_iz", "b_in", "b_hr", "b_hz", "b_hn"]):
        biases = biases.at[i, :].set(p[name])
    biases = biases.at[9, 0:A].set(p["b_a"])
    biases = biases.at[9, A].set(p["b_v"][0])
    return {"w_emb": w_emb, "w_stack": w_stack, "w_head": w_head, "biases": biases}


@jax.jit
def policy_act(robot, human, rnn_hxs, masks, packed):
    """Policy.act(deterministic=True). Returns
    (value, action, action_log_probs, rnn_hxs, attention_weights, dist_entropy)."""
    f32 = jnp.float32
    b = robot.shape[0]
    pad_b = B_P - b

    robot_p = jnp.pad(robot.astype(f32), ((0, pad_b), (0, D_RP - D_R)))
    hxs_p = jnp.pad(rnn_hxs.astype(f32), ((0, pad_b), (0, 0)))
    masks_p = jnp.pad(masks.astype(f32), ((0, pad_b), (0, 0)))
    obs = jnp.concatenate(
        [robot_p, hxs_p, masks_p,
         jnp.zeros((B_P, OBS_W - (D_RP + H + 1)), f32)], axis=1)             # (B_P, OBS_W)

    human_p = jnp.pad(human.astype(f32), ((0, pad_b), (0, 0), (0, D_HP - D_H)))
    # human-major flattening: rows n*B_P + b  (keeps in-kernel splits tile-aligned)
    human_hm = jnp.transpose(human_p, (1, 0, 2)).reshape(N_H * B_P, D_HP)

    slab = pl.pallas_call(
        _policy_act_kernel,
        out_shape=jax.ShapeDtypeStruct((B_P, OUT_W), f32),
    )(obs, human_hm, packed["w_emb"], packed["w_stack"],
      packed["w_head"], packed["biases"])

    value = slab[:b, 0:1]
    action = slab[:b, 1:2].astype(jnp.int32)
    action_log_probs = slab[:b, 2:3]
    dist_entropy = jnp.mean(slab[:b, 3:4], keepdims=True)                    # (1, 1)
    attention_weights = slab[:b, 8:8 + N_H]
    rnn_hxs_new = slab[:b, 16:16 + H]
    return (value, action, action_log_probs, rnn_hxs_new,
            attention_weights, dist_entropy)


if __name__ == "__main__":
    key = jax.random.PRNGKey(0)
    k_r, k_h, k_hx, k_p = jax.random.split(key, 4)

    robot = jax.random.normal(k_r, (B, D_R), dtype=jnp.float32)
    human = jax.random.normal(k_h, (B, N_H, D_H), dtype=jnp.float32)
    rnn_hxs = jax.random.normal(k_hx, (B, H), dtype=jnp.float32) * 0.1
    masks = jnp.ones((B, 1), dtype=jnp.float32)
    packed = pack_params(init_params(k_p))

    outs = policy_act(robot, human, rnn_hxs, masks, packed)
    outs = jax.block_until_ready(outs)

    value, action, action_log_probs, new_hxs, attn_w, dist_entropy = outs
    assert value.shape == (B, 1)
    assert action.shape == (B, 1) and action.dtype == jnp.int32
    assert action_log_probs.shape == (B, 1)
    assert new_hxs.shape == (B, H)
    assert attn_w.shape == (B, N_H)
    assert dist_entropy.shape == (1, 1)
    # attention weights must sum to ~1 per batch row (approx-reciprocal normalization)
    assert bool(jnp.all(jnp.abs(jnp.sum(attn_w, axis=-1) - 1.0) < 5e-3))
    assert bool(jnp.all(action >= 0)) and bool(jnp.all(action < A))
    assert bool(jnp.all(action_log_probs <= 0.0))

    print("KERNEL_OK")
</pallas_src>

<mosaic_0001>
module attributes {stable_mosaic.version = 11 : i64} {
  func.func @_policy_act_kernel(%arg0: memref<8x48xf32, #tpu.memory_space<vmem>>, %arg1: memref<40x8xf32, #tpu.memory_space<vmem>>, %arg2: memref<16x32xf32, #tpu.memory_space<vmem>>, %arg3: memref<288x32xf32, #tpu.memory_space<vmem>>, %arg4: memref<32x8xf32, #tpu.memory_space<vmem>>, %arg5: memref<16x32xf32, #tpu.memory_space<vmem>>, %arg6: memref<8x128xf32, #tpu.memory_space<vmem>>) attributes {dimension_semantics = [], scalar_prefetch = 0 : i64, scratch_operands = 0 : i64, tpu.core_type = #tpu.core_type<tc>} {
    %c0 = arith.constant 0 : index
    %c0_0 = arith.constant 0 : index
    %0 = vector.load %arg0[%c0, %c0_0] : memref<8x48xf32, #tpu.memory_space<vmem>>, vector<8x8xf32>
    %c0_1 = arith.constant 0 : index
    %c8 = arith.constant 8 : index
    %1 = vector.load %arg0[%c0_1, %c8] : memref<8x48xf32, #tpu.memory_space<vmem>>, vector<8x32xf32>
    %c0_2 = arith.constant 0 : index
    %c40 = arith.constant 40 : index
    %2 = vector.load %arg0[%c0_2, %c40] : memref<8x48xf32, #tpu.memory_space<vmem>>, vector<8x1xf32>
    %c0_3 = arith.constant 0 : index
    %c0_4 = arith.constant 0 : index
    %3 = vector.load %arg2[%c0_3, %c0_4] : memref<16x32xf32, #tpu.memory_space<vmem>>, vector<8x32xf32>
    %c8_5 = arith.constant 8 : index
    %c0_6 = arith.constant 0 : index
    %4 = vector.load %arg2[%c8_5, %c0_6] : memref<16x32xf32, #tpu.memory_space<vmem>>, vector<8x32xf32>
    %c0_7 = arith.constant 0 : index
    %c0_8 = arith.constant 0 : index
    %5 = vector.load %arg5[%c0_7, %c0_8] : memref<16x32xf32, #tpu.memory_space<vmem>>, vector<1x32xf32>
    %c1 = arith.constant 1 : index
    %c0_9 = arith.constant 0 : index
    %6 = vector.load %arg5[%c1, %c0_9] : memref<16x32xf32, #tpu.memory_space<vmem>>, vector<1x32xf32>
    %cst = arith.constant dense<0.000000e+00> : vector<8x32xf32>
    %7 = tpu.matmul %0, %3, %cst {dimension_numbers = #tpu.dot_dimension_numbers<[1], [0], [0], [1], [0, 0, 1, 1], [], []>} : vector<8x8xf32>, vector<8x32xf32>, vector<8x32xf32> -> vector<8x32xf32>
    %8 = vector.broadcast %5 : vector<1x32xf32> to vector<8x32xf32>
    %9 = arith.addf %7, %8 : vector<8x32xf32>
    %cst_10 = arith.constant 0.000000e+00 : f32
    %10 = vector.broadcast %cst_10 : f32 to vector<8x32xf32>
    %11 = arith.maximumf %9, %10 : vector<8x32xf32>
    %c0_11 = arith.constant 0 : index
    %c0_12 = arith.constant 0 : index
    %12 = vector.load %arg1[%c0_11, %c0_12] : memref<40x8xf32, #tpu.memory_space<vmem>>, vector<40x8xf32>
    %cst_13 = arith.constant dense<0.000000e+00> : vector<40x32xf32>
    %13 = tpu.matmul %12, %4, %cst_13 {dimension_numbers = #tpu.dot_dimension_numbers<[1], [0], [0], [1], [0, 0, 1, 1], [], []>} : vector<40x8xf32>, vector<8x32xf32>, vector<40x32xf32> -> vector<40x32xf32>
    %14 = vector.broadcast %6 : vector<1x32xf32> to vector<40x32xf32>
    %15 = arith.addf %13, %14 : vector<40x32xf32>
    %cst_14 = arith.constant 0.000000e+00 : f32
    %16 = vector.broadcast %cst_14 : f32 to vector<40x32xf32>
    %17 = arith.maximumf %15, %16 : vector<40x32xf32>
    %18 = vector.shape_cast %17 : vector<40x32xf32> to vector<5x8x32xf32>
    %c0_15 = arith.constant 0 : index
    %c0_16 = arith.constant 0 : index
    %19 = vector.load %arg3[%c0_15, %c0_16] : memref<288x32xf32, #tpu.memory_space<vmem>>, vector<32x32xf32>
    %cst_17 = arith.constant dense<0.000000e+00> : vector<8x32xf32>
    %20 = tpu.matmul %11, %19, %cst_17 {dimension_numbers = #tpu.dot_dimension_numbers<[1], [0], [0], [1], [0, 0, 1, 1], [], []>} : vector<8x32xf32>, vector<32x32xf32>, vector<8x32xf32> -> vector<8x32xf32>
    %21 = vector.shape_cast %20 : vector<8x32xf32> to vector<1x8x32xf32>
    %22 = vector.broadcast %21 : vector<1x8x32xf32> to vector<5x8x32xf32>
    %23 = arith.mulf %18, %22 : vector<5x8x32xf32>
    %cst_18 = arith.constant dense<0.000000e+00> : vector<5x8xf32>
    %24 = vector.multi_reduction <add>, %23, %cst_18 [2] : vector<5x8x32xf32> to vector<5x8xf32>
    %25 = vector.shape_cast %24 : vector<5x8xf32> to vector<5x8x1xf32>
    %cst_19 = arith.constant 0.176776692 : f32
    %26 = vector.broadcast %cst_19 : f32 to vector<5x8x1xf32>
    %27 = arith.mulf %25, %26 : vector<5x8x1xf32>
    %cst_20 = arith.constant dense<0xFF800000> : vector<8x1xf32>
    %28 = vector.multi_reduction <maximumf>, %27, %cst_20 [0] : vector<5x8x1xf32> to vector<8x1xf32>
    %29 = vector.shape_cast %28 : vector<8x1xf32> to vector<1x8x1xf32>
    %30 = vector.broadcast %29 : vector<1x8x1xf32> to vector<5x8x1xf32>
    %31 = arith.subf %27, %30 : vector<5x8x1xf32>
    %32 = math.exp %31 : vector<5x8x1xf32>
    %cst_21 = arith.constant dense<0.000000e+00> : vector<8x1xf32>
    %33 = vector.multi_reduction <add>, %32, %cst_21 [0] : vector<5x8x1xf32> to vector<8x1xf32>
    %34 = vector.shape_cast %33 : vector<8x1xf32> to vector<1x8x1xf32>
    %35 = tpu.reciprocal %34 {approx = true} : vector<1x8x1xf32> -> vector<1x8x1xf32>
    %36 = vector.broadcast %35 : vector<1x8x1xf32> to vector<5x8x1xf32>
    %37 = arith.mulf %32, %36 : vector<5x8x1xf32>
    %38 = vector.broadcast %37 : vector<5x8x1xf32> to vector<5x8x32xf32>
    %39 = arith.mulf %38, %18 : vector<5x8x32xf32>
    %cst_22 = arith.constant dense<0.000000e+00> : vector<8x32xf32>
    %40 = vector.multi_reduction <add>, %39, %cst_22 [0] : vector<5x8x32xf32> to vector<8x32xf32>
    %c32 = arith.constant 32 : index
    %c0_23 = arith.constant 0 : index
    %41 = vector.load %arg3[%c32, %c0_23] : memref<288x32xf32, #tpu.memory_space<vmem>>, vector<32x32xf32>
    %c64 = arith.constant 64 : index
    %c0_24 = arith.constant 0 : index
    %42 = vector.load %arg3[%c64, %c0_24] : memref<288x32xf32, #tpu.memory_space<vmem>>, vector<32x32xf32>
    %c2 = arith.constant 2 : index
    %c0_25 = arith.constant 0 : index
    %43 = vector.load %arg5[%c2, %c0_25] : memref<16x32xf32, #tpu.memory_space<vmem>>, vector<1x32xf32>
    %cst_26 = arith.constant dense<0.000000e+00> : vector<8x32xf32>
    %44 = tpu.matmul %11, %41, %cst_26 {dimension_numbers = #tpu.dot_dimension_numbers<[1], [0], [0], [1], [0, 0, 1, 1], [], []>} : vector<8x32xf32>, vector<32x32xf32>, vector<8x32xf32> -> vector<8x32xf32>
    %cst_27 = arith.constant dense<0.000000e+00> : vector<8x32xf32>
    %45 = tpu.matmul %40, %42, %cst_27 {dimension_numbers = #tpu.dot_dimension_numbers<[1], [0], [0], [1], [0, 0, 1, 1], [], []>} : vector<8x32xf32>, vector<32x32xf32>, vector<8x32xf32> -> vector<8x32xf32>
    %46 = arith.addf %44, %45 : vector<8x32xf32>
    %47 = vector.broadcast %43 : vector<1x32xf32> to vector<8x32xf32>
    %48 = arith.addf %46, %47 : vector<8x32xf32>
    %cst_28 = arith.constant 0.000000e+00 : f32
    %49 = vector.broadcast %cst_28 : f32 to vector<8x32xf32>
    %50 = arith.maximumf %48, %49 : vector<8x32xf32>
    %51 = vector.broadcast %2 : vector<8x1xf32> to vector<8x32xf32>
    %52 = arith.mulf %1, %51 : vector<8x32xf32>
    %c96 = arith.constant 96 : index
    %c0_29 = arith.constant 0 : index
    %53 = vector.load %arg3[%c96, %c0_29] : memref<288x32xf32, #tpu.memory_space<vmem>>, vector<32x32xf32>
    %c128 = arith.constant 128 : index
    %c0_30 = arith.constant 0 : index
    %54 = vector.load %arg3[%c128, %c0_30] : memref<288x32xf32, #tpu.memory_space<vmem>>, vector<32x32xf32>
    %c160 = arith.constant 160 : index
    %c0_31 = arith.constant 0 : index
    %55 = vector.load %arg3[%c160, %c0_31] : memref<288x32xf32, #tpu.memory_space<vmem>>, vector<32x32xf32>
    %c192 = arith.constant 192 : index
    %c0_32 = arith.constant 0 : index
    %56 = vector.load %arg3[%c192, %c0_32] : memref<288x32xf32, #tpu.memory_space<vmem>>, vector<32x32xf32>
    %c224 = arith.constant 224 : index
    %c0_33 = arith.constant 0 : index
    %57 = vector.load %arg3[%c224, %c0_33] : memref<288x32xf32, #tpu.memory_space<vmem>>, vector<32x32xf32>
    %c256 = arith.constant 256 : index
    %c0_34 = arith.constant 0 : index
    %58 = vector.load %arg3[%c256, %c0_34] : memref<288x32xf32, #tpu.memory_space<vmem>>, vector<32x32xf32>
    %c3 = arith.constant 3 : index
    %c0_35 = arith.constant 0 : index
    %59 = vector.load %arg5[%c3, %c0_35] : memref<16x32xf32, #tpu.memory_space<vmem>>, vector<1x32xf32>
    %c4 = arith.constant 4 : index
    %c0_36 = arith.constant 0 : index
    %60 = vector.load %arg5[%c4, %c0_36] : memref<16x32xf32, #tpu.memory_space<vmem>>, vector<1x32xf32>
    %c5 = arith.constant 5 : index
    %c0_37 = arith.constant 0 : index
    %61 = vector.load %arg5[%c5, %c0_37] : memref<16x32xf32, #tpu.memory_space<vmem>>, vector<1x32xf32>
    %c6 = arith.constant 6 : index
    %c0_38 = arith.constant 0 : index
    %62 = vector.load %arg5[%c6, %c0_38] : memref<16x32xf32, #tpu.memory_space<vmem>>, vector<1x32xf32>
    %c7 = arith.constant 7 : index
    %c0_39 = arith.constant 0 : index
    %63 = vector.load %arg5[%c7, %c0_39] : memref<16x32xf32, #tpu.memory_space<vmem>>, vector<1x32xf32>
    %c8_40 = arith.constant 8 : index
    %c0_41 = arith.constant 0 : index
    %64 = vector.load %arg5[%c8_40, %c0_41] : memref<16x32xf32, #tpu.memory_space<vmem>>, vector<1x32xf32>
    %cst_42 = arith.constant dense<0.000000e+00> : vector<8x32xf32>
    %65 = tpu.matmul %50, %53, %cst_42 {dimension_numbers = #tpu.dot_dimension_numbers<[1], [0], [0], [1], [0, 0, 1, 1], [], []>} : vector<8x32xf32>, vector<32x32xf32>, vector<8x32xf32> -> vector<8x32xf32>
    %66 = vector.broadcast %59 : vector<1x32xf32> to vector<8x32xf32>
    %67 = arith.addf %65, %66 : vector<8x32xf32>
    %cst_43 = arith.constant dense<0.000000e+00> : vector<8x32xf32>
    %68 = tpu.matmul %52, %56, %cst_43 {dimension_numbers = #tpu.dot_dimension_numbers<[1], [0], [0], [1], [0, 0, 1, 1], [], []>} : vector<8x32xf32>, vector<32x32xf32>, vector<8x32xf32> -> vector<8x32xf32>
    %69 = arith.addf %67, %68 : vector<8x32xf32>
    %70 = vector.broadcast %62 : vector<1x32xf32> to vector<8x32xf32>
    %71 = arith.addf %69, %70 : vector<8x32xf32>
    %72 = arith.negf %71 : vector<8x32xf32>
    %73 = math.exp %72 : vector<8x32xf32>
    %cst_44 = arith.constant 1.000000e+00 : f32
    %74 = vector.broadcast %cst_44 : f32 to vector<8x32xf32>
    %75 = arith.addf %74, %73 : vector<8x32xf32>
    %76 = arith.divf %74, %75 : vector<8x32xf32>
    %cst_45 = arith.constant dense<0.000000e+00> : vector<8x32xf32>
    %77 = tpu.matmul %50, %54, %cst_45 {dimension_numbers = #tpu.dot_dimension_numbers<[1], [0], [0], [1], [0, 0, 1, 1], [], []>} : vector<8x32xf32>, vector<32x32xf32>, vector<8x32xf32> -> vector<8x32xf32>
    %78 = vector.broadcast %60 : vector<1x32xf32> to vector<8x32xf32>
    %79 = arith.addf %77, %78 : vector<8x32xf32>
    %cst_46 = arith.constant dense<0.000000e+00> : vector<8x32xf32>
    %80 = tpu.matmul %52, %57, %cst_46 {dimension_numbers = #tpu.dot_dimension_numbers<[1], [0], [0], [1], [0, 0, 1, 1], [], []>} : vector<8x32xf32>, vector<32x32xf32>, vector<8x32xf32> -> vector<8x32xf32>
    %81 = arith.addf %79, %80 : vector<8x32xf32>
    %82 = vector.broadcast %63 : vector<1x32xf32> to vector<8x32xf32>
    %83 = arith.addf %81, %82 : vector<8x32xf32>
    %84 = arith.negf %83 : vector<8x32xf32>
    %85 = math.exp %84 : vector<8x32xf32>
    %cst_47 = arith.constant 1.000000e+00 : f32
    %86 = vector.broadcast %cst_47 : f32 to vector<8x32xf32>
    %87 = arith.addf %86, %85 : vector<8x32xf32>
    %88 = arith.divf %86, %87 : vector<8x32xf32>
    %cst_48 = arith.constant dense<0.000000e+00> : vector<8x32xf32>
    %89 = tpu.matmul %50, %55, %cst_48 {dimension_numbers = #tpu.dot_dimension_numbers<[1], [0], [0], [1], [0, 0, 1, 1], [], []>} : vector<8x32xf32>, vector<32x32xf32>, vector<8x32xf32> -> vector<8x32xf32>
    %90 = vector.broadcast %61 : vector<1x32xf32> to vector<8x32xf32>
    %91 = arith.addf %89, %90 : vector<8x32xf32>
    %cst_49 = arith.constant dense<0.000000e+00> : vector<8x32xf32>
    %92 = tpu.matmul %52, %58, %cst_49 {dimension_numbers = #tpu.dot_dimension_numbers<[1], [0], [0], [1], [0, 0, 1, 1], [], []>} : vector<8x32xf32>, vector<32x32xf32>, vector<8x32xf32> -> vector<8x32xf32>
    %93 = vector.broadcast %64 : vector<1x32xf32> to vector<8x32xf32>
    %94 = arith.addf %92, %93 : vector<8x32xf32>
    %95 = arith.mulf %76, %94 : vector<8x32xf32>
    %96 = arith.addf %91, %95 : vector<8x32xf32>
    %97 = math.tanh %96 : vector<8x32xf32>
    %cst_50 = arith.constant 1.000000e+00 : f32
    %98 = vector.broadcast %cst_50 : f32 to vector<8x32xf32>
    %99 = arith.subf %98, %88 : vector<8x32xf32>
    %100 = arith.mulf %99, %97 : vector<8x32xf32>
    %101 = arith.mulf %88, %52 : vector<8x32xf32>
    %102 = arith.addf %100, %101 : vector<8x32xf32>
    %c0_51 = arith.constant 0 : index
    %c0_52 = arith.constant 0 : index
    %103 = vector.load %arg4[%c0_51, %c0_52] : memref<32x8xf32, #tpu.memory_space<vmem>>, vector<32x8xf32>
    %cst_53 = arith.constant dense<0.000000e+00> : vector<8x8xf32>
    %104 = tpu.matmul %102, %103, %cst_53 {dimension_numbers = #tpu.dot_dimension_numbers<[1], [0], [0], [1], [0, 0, 1, 1], [], []>} : vector<8x32xf32>, vector<32x8xf32>, vector<8x8xf32> -> vector<8x8xf32>
    %c9 = arith.constant 9 : index
    %c0_54 = arith.constant 0 : index
    %105 = vector.load %arg5[%c9, %c0_54] : memref<16x32xf32, #tpu.memory_space<vmem>>, vector<1x8xf32>
    %106 = vector.broadcast %105 : vector<1x8xf32> to vector<8x8xf32>
    %107 = arith.addf %104, %106 : vector<8x8xf32>
    %108 = vector.extract_strided_slice %107 {offsets = [0, 0], sizes = [8, 5], strides = [1, 1]} : vector<8x8xf32> to vector<8x5xf32>
    %109 = vector.extract_strided_slice %107 {offsets = [0, 5], sizes = [8, 1], strides = [1, 1]} : vector<8x8xf32> to vector<8x1xf32>
    %cst_55 = arith.constant dense<0xFF800000> : vector<8xf32>
    %110 = vector.multi_reduction <maximumf>, %108, %cst_55 [1] : vector<8x5xf32> to vector<8xf32>
    %111 = vector.shape_cast %110 : vector<8xf32> to vector<8x1xf32>
    %112 = vector.broadcast %111 : vector<8x1xf32> to vector<8x5xf32>
    %113 = arith.subf %108, %112 : vector<8x5xf32>
    %114 = math.exp %113 : vector<8x5xf32>
    %cst_56 = arith.constant dense<0.000000e+00> : vector<8xf32>
    %115 = vector.multi_reduction <add>, %114, %cst_56 [1] : vector<8x5xf32> to vector<8xf32>
    %116 = vector.shape_cast %115 : vector<8xf32> to vector<8x1xf32>
    %117 = math.log %116 : vector<8x1xf32>
    %118 = vector.broadcast %117 : vector<8x1xf32> to vector<8x5xf32>
    %119 = arith.subf %113, %118 : vector<8x5xf32>
    %120 = math.exp %119 : vector<8x5xf32>
    %121 = tpu.iota {dimensions = array<i32: 1>} : vector<8x5xi32>
    %122 = vector.broadcast %111 : vector<8x1xf32> to vector<8x5xf32>
    %123 = arith.cmpf oge, %108, %122 : vector<8x5xf32>
    %c5_i32 = arith.constant 5 : i32
    %124 = vector.broadcast %c5_i32 : i32 to vector<8x5xi32>
    %125 = arith.select %123, %121, %124 : vector<8x5xi1>, vector<8x5xi32>
    %cst_57 = arith.constant dense<2147483647> : vector<8xi32>
    %126 = vector.multi_reduction <minsi>, %125, %cst_57 [1] : vector<8x5xi32> to vector<8xi32>
    %127 = vector.shape_cast %126 : vector<8xi32> to vector<8x1xi32>
    %128 = vector.broadcast %127 : vector<8x1xi32> to vector<8x5xi32>
    %129 = arith.cmpi eq, %121, %128 : vector<8x5xi32>
    %130 = arith.extui %129 : vector<8x5xi1> to vector<8x5xi32>
    %131 = arith.sitofp %130 : vector<8x5xi32> to vector<8x5xf32>
    %132 = arith.mulf %119, %131 : vector<8x5xf32>
    %cst_58 = arith.constant dense<0.000000e+00> : vector<8xf32>
    %133 = vector.multi_reduction <add>, %132, %cst_58 [1] : vector<8x5xf32> to vector<8xf32>
    %134 = vector.shape_cast %133 : vector<8xf32> to vector<8x1xf32>
    %135 = arith.mulf %120, %119 : vector<8x5xf32>
    %cst_59 = arith.constant dense<0.000000e+00> : vector<8xf32>
    %136 = vector.multi_reduction <add>, %135, %cst_59 [1] : vector<8x5xf32> to vector<8xf32>
    %137 = vector.shape_cast %136 : vector<8xf32> to vector<8x1xf32>
    %cst_60 = arith.constant 0.000000e+00 : f32
    %138 = vector.broadcast %cst_60 : f32 to vector<8x1xf32>
    %139 = arith.subf %138, %137 : vector<8x1xf32>
    %cst_61 = arith.constant 0.000000e+00 : f32
    %140 = vector.broadcast %cst_61 : f32 to vector<8x128xf32>
    %c0_62 = arith.constant 0 : index
    %c0_63 = arith.constant 0 : index
    %141 = vector.load %arg6[%c0_62, %c0_63] : memref<8x128xf32, #tpu.memory_space<vmem>>, vector<8x128xf32>
    tpu.vector_store %arg6[%c0_62, %c0_63], %140 {strides = array<i32>} : memref<8x128xf32, #tpu.memory_space<vmem>>, vector<8x128xf32>,
    %c0_64 = arith.constant 0 : index
    %c0_65 = arith.constant 0 : index
    %142 = vector.load %arg6[%c0_64, %c0_65] : memref<8x128xf32, #tpu.memory_space<vmem>>, vector<8x1xf32>
    tpu.vector_store %arg6[%c0_64, %c0_65], %109 {strides = array<i32>} : memref<8x128xf32, #tpu.memory_space<vmem>>, vector<8x1xf32>,
    %143 = arith.sitofp %127 : vector<8x1xi32> to vector<8x1xf32>
    %c0_66 = arith.constant 0 : index
    %c1_67 = arith.constant 1 : index
    %144 = vector.load %arg6[%c0_66, %c1_67] : memref<8x128xf32, #tpu.memory_space<vmem>>, vector<8x1xf32>
    tpu.vector_store %arg6[%c0_66, %c1_67], %143 {strides = array<i32>} : memref<8x128xf32, #tpu.memory_space<vmem>>, vector<8x1xf32>,
    %c0_68 = arith.constant 0 : index
    %c2_69 = arith.constant 2 : index
    %145 = vector.load %arg6[%c0_68, %c2_69] : memref<8x128xf32, #tpu.memory_space<vmem>>, vector<8x1xf32>
    tpu.vector_store %arg6[%c0_68, %c2_69], %134 {strides = array<i32>} : memref<8x128xf32, #tpu.memory_space<vmem>>, vector<8x1xf32>,
    %c0_70 = arith.constant 0 : index
    %c3_71 = arith.constant 3 : index
    %146 = vector.load %arg6[%c0_70, %c3_71] : memref<8x128xf32, #tpu.memory_space<vmem>>, vector<8x1xf32>
    tpu.vector_store %arg6[%c0_70, %c3_71], %139 {strides = array<i32>} : memref<8x128xf32, #tpu.memory_space<vmem>>, vector<8x1xf32>,
    %147 = vector.extract_strided_slice %37 {offsets = [0, 0, 0], sizes = [1, 8, 1], strides = [1, 1, 1]} : vector<5x8x1xf32> to vector<1x8x1xf32>
    %148 = vector.shape_cast %147 : vector<1x8x1xf32> to vector<8x1xf32>
    %c0_72 = arith.constant 0 : index
    %c8_73 = arith.constant 8 : index
    %149 = vector.load %arg6[%c0_72, %c8_73] : memref<8x128xf32, #tpu.memory_space<vmem>>, vector<8x1xf32>
    tpu.vector_store %arg6[%c0_72, %c8_73], %148 {strides = array<i32>} : memref<8x128xf32, #tpu.memory_space<vmem>>, vector<8x1xf32>,
    %150 = vector.extract_strided_slice %37 {offsets = [1, 0, 0], sizes = [1, 8, 1], strides = [1, 1, 1]} : vector<5x8x1xf32> to vector<1x8x1xf32>
    %151 = vector.shape_cast %150 : vector<1x8x1xf32> to vector<8x1xf32>
    %c0_74 = arith.constant 0 : index
    %c9_75 = arith.constant 9 : index
    %152 = vector.load %arg6[%c0_74, %c9_75] : memref<8x128xf32, #tpu.memory_space<vmem>>, vector<8x1xf32>
    tpu.vector_store %arg6[%c0_74, %c9_75], %151 {strides = array<i32>} : memref<8x128xf32, #tpu.memory_space<vmem>>, vector<8x1xf32>,
    %153 = vector.extract_strided_slice %37 {offsets = [2, 0, 0], sizes = [1, 8, 1], strides = [1, 1, 1]} : vector<5x8x1xf32> to vector<1x8x1xf32>
    %154 = vector.shape_cast %153 : vector<1x8x1xf32> to vector<8x1xf32>
    %c0_76 = arith.constant 0 : index
    %c10 = arith.constant 10 : index
    %155 = vector.load %arg6[%c0_76, %c10] : memref<8x128xf32, #tpu.memory_space<vmem>>, vector<8x1xf32>
    tpu.vector_store %arg6[%c0_76, %c10], %154 {strides = array<i32>} : memref<8x128xf32, #tpu.memory_space<vmem>>, vector<8x1xf32>,
    %156 = vector.extract_strided_slice %37 {offsets = [3, 0, 0], sizes = [1, 8, 1], strides = [1, 1, 1]} : vector<5x8x1xf32> to vector<1x8x1xf32>
    %157 = vector.shape_cast %156 : vector<1x8x1xf32> to vector<8x1xf32>
    %c0_77 = arith.constant 0 : index
    %c11 = arith.constant 11 : index
    %158 = vector.load %arg6[%c0_77, %c11] : memref<8x128xf32, #tpu.memory_space<vmem>>, vector<8x1xf32>
    tpu.vector_store %arg6[%c0_77, %c11], %157 {strides = array<i32>} : memref<8x128xf32, #tpu.memory_space<vmem>>, vector<8x1xf32>,
    %159 = vector.extract_strided_slice %37 {offsets = [4, 0, 0], sizes = [1, 8, 1], strides = [1, 1, 1]} : vector<5x8x1xf32> to vector<1x8x1xf32>
    %160 = vector.shape_cast %159 : vector<1x8x1xf32> to vector<8x1xf32>
    %c0_78 = arith.constant 0 : index
    %c12 = arith.constant 12 : index
    %161 = vector.load %arg6[%c0_78, %c12] : memref<8x128xf32, #tpu.memory_space<vmem>>, vector<8x1xf32>
    tpu.vector_store %arg6[%c0_78, %c12], %160 {strides = array<i32>} : memref<8x128xf32, #tpu.memory_space<vmem>>, vector<8x1xf32>,
    %c0_79 = arith.constant 0 : index
    %c16 = arith.constant 16 : index
    %162 = vector.load %arg6[%c0_79, %c16] : memref<8x128xf32, #tpu.memory_space<vmem>>, vector<8x32xf32>
    tpu.vector_store %arg6[%c0_79, %c16], %102 {strides = array<i32>} : memref<8x128xf32, #tpu.memory_space<vmem>>, vector<8x32xf32>,
    return
  }
}

</mosaic_0001>

<bundles_post_ra>
// kernel: policy_act.1
= control target key start
LH: loop header
LB: loop body
LE: loop exit
PB: predicated region body
PF: predicated region fallthrough
CT: control target
= control target key end

     0   :  { %vm32_vm0 = vcmask 64512   ;;  %v1518_v0 = vmov 0.0   ;;  %vm1519_vm1 = vmmov 0   ;;  %v1520_v7 = vmov 0.0|0.0   ;;  %s1522_s20 = smov 120   ;;  %s1523_s29 = smov 123   ;;  %s1923_s2 = inlined_call_operand.vmem [shape: f32[16,32], index: 2, kind: input, shape index: {}]   ;;  %s1924_s0 = inlined_call_operand.vmem [shape: f32[8,48], index: 0, kind: input, shape index: {}]   ;;  %s1925_s1 = inlined_call_operand.vmem [shape: f32[40,8], index: 1, kind: input, shape index: {}]   ;;  %s1926_s3 = inlined_call_operand.vmem [shape: f32[288,32], index: 3, kind: input, shape index: {}]   ;;  %s1927_s5 = inlined_call_operand.vmem [shape: f32[16,32], index: 5, kind: input, shape index: {}]   ;;  %s1928_s4 = inlined_call_operand.vmem [shape: f32[32,8], index: 4, kind: input, shape index: {}]   ;;  %s1929_s6 = inlined_call_operand.vmem [shape: f32[8,128], index: 6, kind: output, shape index: {}]  }
   0x1   :  { %1289 = vmatprep.subr.mxu0 %v1518_v0  ;;  %v24_v1 = vld [vmem:[%s1923_s2] sm:$0xff]  ;;  %1291 = vmatprep.mubr.msk.f32.mxu0 %vm1519_vm1, %v1518_v0  ;;  %v25_v3 = vld [vmem:[%s1923_s2 + $0x8] sm:$0xff]  ;;  %v109_v13 = vld [vmem:[%s1925_s1 + $0x10] sm:$0xff]  ;;  %vm230_vm2 = vcmask 261120   ;;  %v1521_v62 = vmov 40   ;;  %vm1123_vm3 = vcmask 39936   ;;  %1169 = vst [vmem:[%s1929_s6] sm:$0xff] %v1518_v0 }
   0x2   :  { %v1569_v2 = vld [vmem:[%s1924_s0] sm:$0xff]  ;;  %1290 = vmatpush3.msra.mxu0 %v24_v1  ;;  %1294 = vmatprep.subr.mxu1 %v1518_v0  ;;  %v227_v6 = vld [vmem:[%s1926_s3 + $0x8] sm:$0xff]  ;;  %v110_v14 = vld [vmem:[%s1925_s1 + $0x18] sm:$0xff]  ;;  %s1524_s30 = smov 16   ;;  %vm1174_vm7 = vcmask 7168   ;;  %vm1177_vm8 = vcmask 15368  }
   0x3   :  { %v107_v4 = vld [vmem:[%s1925_s1] sm:$0xff]  ;;  %1292 = vmatmul.mubr.msk.f32.vlgmr.msra.gmra.mrb[0].mxu0 %vm32_vm0, %v1569_v2  ;;  %1295 = vmatpush3.msra.mxu1 %v25_v3  ;;  %v373_v10 = vld [vmem:[%s1926_s3 + $0x28] sm:$0xff]  ;;  %v228_v15 = vld [vmem:[%s1926_s3 + $0x10] sm:$0xff]  ;;  %vm1179_vm9 = vcmask 23568   ;;  %vm1181_vm10 = vcmask 31768   ;;  %vm1183_vm11 = vcmask 72768  }
   0x4   :  { %v226_v5 = vld [vmem:[%s1926_s3] sm:$0xff]  ;;  %1296 = vmatprep.mubr.msk.f32.mxu1 %vm1519_vm1, %v1518_v0  ;;  %1421 = vmatprep.subr.bf16.mxu0 %v1520_v7  ;;  %v108_v12 = vld [vmem:[%s1925_s1 + $0x8] sm:$0xff]  ;;  %v229_v16 = vld [vmem:[%s1926_s3 + $0x18] sm:$0xff]  ;;  %vm1185_vm12 = vcmask 80968   ;;  %vm1187_vm13 = vcmask 89168   ;;  %vm1189_vm14 = vcmask 97368  }
   0x5   :  { %v1422_v8 = vpack.c.bf16 %v227_v6, %v226_v5  ;;  %v372_v9 = vld [vmem:[%s1926_s3 + $0x20] sm:$0xff]  ;;  %1297 = vmatmul.mubr.msk.f32.vlgmr.msra.gmra.mrb[0].mxu1 %vm32_vm0, %v107_v4  ;;  %1433 = vmatprep.subr.bf16.mxu1 %v1520_v7  ;;  %v374_v17 = vld [vmem:[%s1926_s3 + $0x30] sm:$0xff]  ;;  %v1425_v19 = vpack.c.bf16 %v229_v16, %v228_v15  ;;  %v375_v20 = vld [vmem:[%s1926_s3 + $0x38] sm:$0xff]  ;;  %vm1191_vm15 = vcmask 105568  }
   0x6   :  { %v1434_v11 = vpack.c.bf16 %v373_v10, %v372_v9  ;;  %1299 = vmatprep.mubr.msk.f32.mxu1 %vm1519_vm1, %v1518_v0  ;;  %1319 = vmatprep.mubr.msk.f32.mxu0 %vm1519_vm1, %v1518_v0  ;;  %v111_v18 = vld [vmem:[%s1925_s1 + $0x20] sm:$0xff]  ;;  %v1437_v21 = vpack.c.bf16 %v375_v20, %v374_v17  ;;  %v377_v1 = vld [vmem:[%s1926_s3 + $0x48] sm:$0xff]  ;;  %v378_v3 = vld [vmem:[%s1926_s3 + $0x50] sm:$0xff] }
   0x7   :  { %1423 = vmatpush3.bf16.msra.mxu0 %v1422_v8  ;;  %v1202_v22 = vld [vmem:[%s1927_s5] ss:$0 sm:$0xff]  ;;  %v1204_v37 = vld [vmem:[%s1927_s5 + $0x1] ss:$0 sm:$0xff]  ;;  %1488 = vset.pattern.permute.xlu1 %v1521_v62  ;;  %v379_v5 = vld [vmem:[%s1926_s3 + $0x58] sm:$0xff] }
   0x8   :  { %1435 = vmatpush3.bf16.msra.mxu1 %v1434_v11  ;;  %1424 = vmatprep.subr.bf16.mxu0 %v1520_v7  ;;  %v376_v63 = vld [vmem:[%s1926_s3 + $0x40] sm:$0xff]  ;;  %v1431_v6 = vpack.c.bf16 %v379_v5, %v378_v3  ;;  %v548_v9 = vld [vmem:[%s1926_s3 + $0xc8] sm:$0xff]  ;;  %v549_v10 = vld [vmem:[%s1926_s3 + $0xd0] sm:$0xff] }
   0x9   :  { %1436 = vmatprep.subr.bf16.mxu1 %v1520_v7  ;;  %1300 = vmatmul.mubr.msk.f32.gmra.mrb[2].mxu1 %vm32_vm0, %v108_v12  ;;  %v1428_v4 = vpack.c.bf16 %v377_v1, %v376_v63  ;;  %v547_v8 = vld [vmem:[%s1926_s3 + $0xc0] sm:$0xff]  ;;  %v550_v12 = vld [vmem:[%s1926_s3 + $0xd8] sm:$0xff] }
   0xa   :  { %1302 = vmatprep.mubr.msk.f32.mxu1 %vm1519_vm1, %v1518_v0  ;;  %1489 = vset.pattern.permute.xlu0 %v1521_v62  ;;  %v1446_v11 = vpack.c.bf16 %v548_v9, %v547_v8 }
   0xb   :  { %1426 = vmatpush3.bf16.msra.mxu0 %v1425_v19 }
   0xc   :  { %1438 = vmatpush3.bf16.msra.mxu1 %v1437_v21  ;;  %1427 = vmatprep.subr.bf16.mxu0 %v1520_v7 }
   0xd   :  { %1303 = vmatmul.mubr.msk.f32.gmra.mrb[4].mxu1 %vm32_vm0, %v109_v13  ;;  %1445 = vmatprep.subr.bf16.mxu1 %v1520_v7  ;;  %v1449_v13 = vpack.c.bf16 %v550_v12, %v549_v10  ;;  %v552_v12 = vld [vmem:[%s1926_s3 + $0xe8] sm:$0xff] }
   0xe   :  { %1305 = vmatprep.mubr.msk.f32.mxu1 %vm1519_vm1, %v1518_v0 }
  0x11   :  { %1306 = vmatmul.mubr.msk.f32.gmra.mrb[6].mxu1 %vm32_vm0, %v110_v14 }
  0x12   :  { %1308 = vmatprep.mubr.msk.f32.mxu1 %vm1519_vm1, %v1518_v0 }
  0x15   :  { %1309 = vmatmul.mubr.msk.f32.gmra.mrb[8].mxu1 %vm32_vm0, %v111_v18  ;;  %vm1196_vm0 = vcmask 392320  }
  0x16   :  { %1341 = vmatprep.mubr.msk.f32.mxu1 %vm1519_vm1, %v1518_v0 }
  0xd6   :  { %v102_v23 = vpop.f32.mrb[0].mxu0 }
  0xd7   :  { %v103_v24 = vadd.f32 %v1202_v22, %v102_v23  ;;  %v1293_v25 = vpop.f32.mrb[1].mxu0 }
  0xd8   :  { %v197_v26 = vpop.f32.mrb[0].mxu1 }
  0xd9   :  { %v106_v27 = vmax.f32 %v103_v24, 0.0  ;;  %v1298_v28 = vpop.f32.mrb[1].mxu1  ;;  %v1653_v38 = vadd.f32 %v1204_v37, %v197_v26 }
  0xdb   :  { %1320 = vmatmul.mubr.msk.f32.vlgmr.msra.gmra.mrb[2].mxu0 %vm230_vm2, %v106_v27  ;;  %1342 = vmatmul.mubr.msk.f32.vlgmr.msra.gmra.mrb[10].mxu1 %vm230_vm2, %v106_v27  ;;  %v221_v43 = vmax.f32 %v1653_v38, 0.0 }
  0xdc   :  { %v202_v29 = vpop.f32.mrb[2].mxu1  ;;  %1330 = vmatprep.mubr.msk.f32.mxu0 %vm1519_vm1, %v1518_v0  ;;  %1363 = vmatprep.mubr.msk.f32.mxu1 %vm1519_vm1, %v1518_v0 }
  0xdd   :  { %v1301_v30 = vpop.f32.mrb[3].mxu1  ;;  %v1655_v39 = vadd.f32 %v1204_v37, %v202_v29  ;;  %1429 = vmatpush3.bf16.msra.mxu0 %v1428_v4  ;;  %1447 = vmatpush3.bf16.msra.mxu1 %v1446_v11 }
  0xde   :  { %1430 = vmatprep.subr.bf16.mxu0 %v1520_v7  ;;  %1448 = vmatprep.subr.bf16.mxu1 %v1520_v7 }
  0xdf   :  { %v222_v44 = vmax.f32 %v1655_v39, 0.0 }
  0xe0   :  { %v207_v31 = vpop.f32.mrb[4].mxu1 }
  0xe1   :  { %v1304_v32 = vpop.f32.mrb[5].mxu1  ;;  %v1659_v41 = vadd.f32 %v1204_v37, %v207_v31  ;;  %1432 = vmatpush3.bf16.msra.mxu0 %v1431_v6  ;;  %1450 = vmatpush3.bf16.msra.mxu1 %v1449_v13 }
  0xe2   :  { %1439 = vmatprep.subr.bf16.mxu0 %v1520_v7  ;;  %1457 = vmatprep.subr.bf16.mxu1 %v1520_v7 }
  0xe3   :  { %v223_v48 = vmax.f32 %v1659_v41, 0.0  ;;  %v535_v41 = vld [vmem:[%s1926_s3 + $0x60] sm:$0xff] }
  0xe4   :  { %v212_v33 = vpop.f32.mrb[6].mxu1 }
  0xe5   :  { %v1307_v34 = vpop.f32.mrb[7].mxu1  ;;  %v1661_v42 = vadd.f32 %v1204_v37, %v212_v33 }
  0xe7   :  { %v224_v53 = vmax.f32 %v1661_v42, 0.0  ;;  %v536_v42 = vld [vmem:[%s1926_s3 + $0x68] sm:$0xff] }
  0xe8   :  { %v217_v35 = vpop.f32.mrb[8].mxu1  ;;  %v1440_v11 = vpack.c.bf16 %v536_v42, %v535_v41  ;;  %v1217_v41 = vld [vmem:[%s1927_s5 + $0x6] ss:$0 sm:$0xff] }
  0xe9   :  { %v1310_v36 = vpop.f32.mrb[9].mxu1  ;;  %v1657_v40 = vadd.f32 %v1204_v37, %v217_v35 }
  0xeb   :  { %v225_v45 = vmax.f32 %v1657_v40, 0.0 }
 0x1ae   :  { %v300_v46 = vpop.f32.mrb[2].mxu0  ;;  %v1666_v47 = vpop.f32.mrb[10].mxu1 }
 0x1af   :  { %v1321_v49 = vpop.f32.mrb[3].mxu0  ;;  %v1343_v50 = vpop.f32.mrb[11].mxu1  ;;  %v305_v51 = vmul.f32 %v300_v46, %v222_v44  ;;  %v304_v52 = vmul.f32 %v300_v46, %v221_v43  ;;  %v306_v56 = vmul.f32 %v300_v46, %v223_v48  ;;  %v308_v57 = vmul.f32 %v300_v46, %v225_v45 }
 0x1b0   :  { %v307_v60 = vmul.f32 %v300_v46, %v224_v53 }
 0x1b1   :  { %v312_v54 = vsel %vm230_vm2, %v305_v51, 0.0  ;;  %v309_v55 = vsel %vm230_vm2, %v304_v52, 0.0  ;;  %v315_v58 = vsel %vm230_vm2, %v306_v56, 0.0  ;;  %v321_v59 = vsel %vm230_vm2, %v308_v57, 0.0 }
 0x1b2   :  { %313 = vadd.xlane.f32.xlu1 %v312_v54  ;;  %310 = vadd.xlane.f32.xlu0 %v309_v55  ;;  %v318_v61 = vsel %vm230_vm2, %v307_v60, 0.0 }
 0x1b6   :  { %316 = vadd.xlane.f32.xlu1 %v315_v58  ;;  %322 = vadd.xlane.f32.xlu0 %v321_v59 }
 0x1ba   :  { %319 = vadd.xlane.f32.xlu0 %v318_v61 }
 0x1c7   :  { %531 = vperm.xlu1 %1488, %v1569_v2  }
 0x23f   :  { %v314_v14 = vpop.xlane.xlu1 %313  ;;  %v311_v15 = vpop.xlane.xlu0 %310 }
 0x240   :  { %v324_v17 = vmul.f32 0.17677669, %v311_v15  ;;  %v325_v22 = vmul.f32 0.17677669, %v314_v14  ;;  %v553_v14 = vld [vmem:[%s1926_s3 + $0xf0] sm:$0xff]  ;;  %v554_v15 = vld [vmem:[%s1926_s3 + $0xf8] sm:$0xff] }
 0x243   :  { %v323_v16 = vpop.xlane.xlu0 %322  ;;  %v317_v19 = vpop.xlane.xlu1 %316 }
 0x244   :  { %v328_v18 = vmul.f32 0.17677669, %v323_v16  ;;  %v326_v23 = vmul.f32 0.17677669, %v317_v19  ;;  %v556_v19 = vld [vmem:[%s1926_s3 + $0x108] sm:$0xff] }
 0x246   :  { %v329_v20 = vmax.f32 %v324_v17, %v328_v18 }
 0x247   :  { %v320_v21 = vpop.xlane.xlu0 %319  ;;  %v532_v46 = vpop.permute.xlu1 %531 }
 0x248   :  { %v327_v24 = vmul.f32 0.17677669, %v320_v21  ;;  %v330_v25 = vmax.f32 %v329_v20, %v325_v22  ;;  %v534_v49 = vmul.f32 %v532_v46, %v1569_v2  ;;  %v537_v21 = vld [vmem:[%s1926_s3 + $0x70] sm:$0xff]  ;;  %v543_v46 = vld [vmem:[%s1926_s3 + $0xa0] sm:$0xff] }
 0x24a   :  { %v331_v26 = vmax.f32 %v326_v23, %v327_v24  ;;  %643 = vrot.lane.b32.xlu0 %v534_v49, %s1522_s20  ;;  %v544_v49 = vld [vmem:[%s1926_s3 + $0xa8] sm:$0xff] }
 0x24c   :  { %v332_v27 = vmax.f32 %v330_v25, %v331_v26  ;;  %v558_v25 = vld [vmem:[%s1926_s3 + $0x118] sm:$0xff] }
 0x24e   :  { %v333_v28 = vsub.f32 %v324_v17, %v332_v27  ;;  %v334_v29 = vsub.f32 %v325_v22, %v332_v27  ;;  %v335_v30 = vsub.f32 %v326_v23, %v332_v27  ;;  %v336_v31 = vsub.f32 %v327_v24, %v332_v27  ;;  %v538_v22 = vld [vmem:[%s1926_s3 + $0x78] sm:$0xff]  ;;  %v557_v24 = vld [vmem:[%s1926_s3 + $0x110] sm:$0xff] }
 0x24f   :  { %v337_v34 = vsub.f32 %v328_v18, %v332_v27  ;;  %v1461_v17 = vpack.c.bf16 %v554_v15, %v553_v14  ;;  %v555_v18 = vld [vmem:[%s1926_s3 + $0x100] sm:$0xff]  ;;  %v1443_v23 = vpack.c.bf16 %v538_v22, %v537_v21  ;;  %v1473_v26 = vpack.c.bf16 %v558_v25, %v557_v24  ;;  %v1226_v21 = vld [vmem:[%s1927_s5 + $0x8] ss:$0 sm:$0xff] }
 0x250   :  { %v338_v32 = vmul.f32 1.442695, %v333_v28  ;;  %v340_v33 = vmul.f32 1.442695, %v334_v29  ;;  %v342_v35 = vmul.f32 1.442695, %v335_v30  ;;  %v1470_v20 = vpack.c.bf16 %v556_v19, %v555_v18 }
 0x251   :  { %v344_v36 = vmul.f32 1.442695, %v336_v31  ;;  %v346_v37 = vmul.f32 1.442695, %v337_v34  ;;  %v1213_v27 = vld [vmem:[%s1927_s5 + $0x2] ss:$0 sm:$0xff] }
 0x252   :  { %1490 = vpow2.f32 %v338_v32  ;;  %v539_v31 = vld [vmem:[%s1926_s3 + $0x80] sm:$0xff]  ;;  %v540_v32 = vld [vmem:[%s1926_s3 + $0x88] sm:$0xff] }
 0x253   :  { %1492 = vpow2.f32 %v340_v33  ;;  %v1452_v34 = vpack.c.bf16 %v540_v32, %v539_v31 }
 0x254   :  { %1494 = vpow2.f32 %v342_v35 }
 0x255   :  { %1496 = vpow2.f32 %v344_v36  ;;  %v541_v36 = vld [vmem:[%s1926_s3 + $0x90] sm:$0xff] }
 0x256   :  { %1498 = vpow2.f32 %v346_v37 }
 0x25c   :  { %v1491_v50 = vpop.eup %1490 }
 0x25d   :  { %v1493_v51 = vpop.eup %1492 }
 0x25e   :  { %v348_v52 = vadd.f32 %v1493_v51, %v1491_v50  ;;  %v1495_v54 = vpop.eup %1494 }
 0x25f   :  { %v1497_v56 = vpop.eup %1496 }
 0x260   :  { %v349_v55 = vadd.f32 %v1495_v54, %v348_v52  ;;  %v1499_v58 = vpop.eup %1498  ;;  %v546_v52 = vld [vmem:[%s1926_s3 + $0xb8] sm:$0xff] }
 0x262   :  { %v350_v57 = vadd.f32 %v1497_v56, %v349_v55 }
 0x264   :  { %v351_v59 = vadd.f32 %v1499_v58, %v350_v57 }
 0x266   :  { %1500 = vrcp.f32 %v351_v59 }
 0x270   :  { %v1501_v60 = vpop.eup %1500 }
 0x271   :  { %v1715_v61 = vmul.f32 %v1501_v60, %v1497_v56  ;;  %v1717_v62 = vmul.f32 %v1501_v60, %v1491_v50  ;;  %v1719_v63 = vmul.f32 %v1501_v60, %v1493_v51  ;;  %v1721_v2 = vmul.f32 %v1501_v60, %v1495_v54  ;;  %v545_v51 = vld [vmem:[%s1926_s3 + $0xb0] sm:$0xff] }
 0x272   :  { %v1723_v1 = vmul.f32 %v1501_v60, %v1499_v58  ;;  %v1464_v50 = vpack.c.bf16 %v544_v49, %v543_v46  ;;  %v1467_v54 = vpack.c.bf16 %v546_v52, %v545_v51  ;;  %v1138_v49 = vlaneseq }
 0x273   :  { %v358_v3 = vmul.f32 %v1717_v62, %v221_v43  ;;  %v359_v4 = vmul.f32 %v1719_v63, %v222_v44  ;;  %v360_v5 = vmul.f32 %v1721_v2, %v223_v48  ;;  %v361_v6 = vmul.f32 %v1715_v61, %v224_v53 }
 0x274   :  { %v362_v38 = vmul.f32 %v1723_v1, %v225_v45  ;;  %v551_v45 = vld [vmem:[%s1926_s3 + $0xe0] sm:$0xff] }
 0x275   :  { %v363_v8 = vsel %vm230_vm2, %v358_v3, 0.0  ;;  %v364_v9 = vsel %vm230_vm2, %v359_v4, 0.0  ;;  %v366_v39 = vsel %vm230_vm2, %v360_v5, 0.0  ;;  %v368_v44 = vsel %vm230_vm2, %v361_v6, 0.0  ;;  %v1041_v3 = vld [vmem:[%s1928_s4] sm:$0xff]  ;;  %v1042_v4 = vld [vmem:[%s1928_s4 + $0x8] sm:$0xff] }
 0x276   :  { %v365_v10 = vadd.f32 %v364_v9, %v363_v8  ;;  %v370_v53 = vsel %vm230_vm2, %v362_v38, 0.0  ;;  %v1458_v13 = vpack.c.bf16 %v552_v12, %v551_v45  ;;  %v1043_v5 = vld [vmem:[%s1928_s4 + $0x10] sm:$0xff]  ;;  %v1476_v6 = vpack.c.bf16 %v1042_v4, %v1041_v3  ;;  %v1044_v8 = vld [vmem:[%s1928_s4 + $0x18] sm:$0xff]  ;;  %v1222_v45 = vld [vmem:[%s1927_s5 + $0x7] ss:$0 sm:$0xff] }
 0x277   :  { %v1479_v9 = vpack.c.bf16 %v1044_v8, %v1043_v5 }
 0x278   :  { %v367_v43 = vadd.f32 %v366_v39, %v365_v10  ;;  %v1214_v10 = vld [vmem:[%s1927_s5 + $0x3] ss:$0 sm:$0xff] }
 0x27a   :  { %v369_v48 = vadd.f32 %v368_v44, %v367_v43 }
 0x27c   :  { %v371_v40 = vadd.f32 %v370_v53, %v369_v48  ;;  %v1219_v48 = vld [vmem:[%s1927_s5 + $0x4] ss:$0 sm:$0xff] }
 0x27e   :  { %1331 = vmatmul.mubr.msk.f32.vlgmr.msra.gmra.mrb[4].mxu0 %vm230_vm2, %v371_v40 }
 0x27f   :  { %1441 = vmatpush3.bf16.msra.mxu0 %v1440_v11  ;;  %1352 = vmatprep.mubr.msk.f32.mxu0 %vm1519_vm1, %v1518_v0 }
 0x280   :  { %1442 = vmatprep.subr.bf16.mxu0 %v1520_v7 }
 0x283   :  { %1444 = vmatpush3.bf16.msra.mxu0 %v1443_v23  ;;  %v1224_v23 = vld [vmem:[%s1927_s5 + $0x5] ss:$0 sm:$0xff] }
 0x284   :  { %1451 = vmatprep.subr.bf16.mxu0 %v1520_v7 }
 0x2bc   :  { %v1767_v16 = vpop.permute.xlu0 %643 }
 0x2bd   :  { %1364 = vmatmul.mubr.msk.f32.vlgmr.msra.gmra.mrb[12].mxu1 %vm230_vm2, %v1767_v16 }
 0x2be   :  { %1459 = vmatpush3.bf16.msra.mxu1 %v1458_v13  ;;  %1385 = vmatprep.mubr.msk.f32.mxu1 %vm1519_vm1, %v1518_v0 }
 0x2bf   :  { %1460 = vmatprep.subr.bf16.mxu1 %v1520_v7 }
 0x2c2   :  { %1462 = vmatpush3.bf16.msra.mxu1 %v1461_v17 }
 0x2c3   :  { %1469 = vmatprep.subr.bf16.mxu1 %v1520_v7 }
 0x2c5   :  { %1386 = vmatmul.mubr.msk.f32.vlgmr.msra.gmra.mrb[14].mxu1 %vm230_vm2, %v1767_v16 }
 0x2c6   :  { %1471 = vmatpush3.bf16.msra.mxu1 %v1470_v20  ;;  %1407 = vmatprep.mubr.msk.f32.mxu1 %vm1519_vm1, %v1518_v0 }
 0x2c7   :  { %1472 = vmatprep.subr.bf16.mxu1 %v1520_v7 }
 0x2ca   :  { %1474 = vmatpush3.bf16.msra.mxu1 %v1473_v26 }
 0x2cd   :  { %1408 = vmatmul.mubr.msk.f32.vlgmr.msra.gmra.mrb[16].mxu1 %vm230_vm2, %v1767_v16 }
 0x351   :  { %v450_v28 = vpop.f32.mrb[4].mxu0 }
 0x352   :  { %v521_v29 = vadd.f32 %v1666_v47, %v450_v28  ;;  %v1332_v30 = vpop.f32.mrb[5].mxu0  ;;  %v542_v47 = vld [vmem:[%s1926_s3 + $0x98] sm:$0xff] }
 0x353   :  { %v1455_v37 = vpack.c.bf16 %v542_v47, %v541_v36 }
 0x354   :  { %v528_v33 = vadd.f32 %v1213_v27, %v521_v29 }
 0x356   :  { %v529_v35 = vmax.f32 %v528_v33, 0.0 }
 0x358   :  { %1353 = vmatmul.mubr.msk.f32.vlgmr.msra.gmra.mrb[6].mxu0 %vm230_vm2, %v529_v35 }
 0x359   :  { %1453 = vmatpush3.bf16.msra.mxu0 %v1452_v34  ;;  %1374 = vmatprep.mubr.msk.f32.mxu0 %vm1519_vm1, %v1518_v0 }
 0x35a   :  { %1454 = vmatprep.subr.bf16.mxu0 %v1520_v7 }
 0x35d   :  { %1456 = vmatpush3.bf16.msra.mxu0 %v1455_v37 }
 0x35e   :  { %1463 = vmatprep.subr.bf16.mxu0 %v1520_v7 }
 0x360   :  { %1375 = vmatmul.mubr.msk.f32.vlgmr.msra.gmra.mrb[8].mxu0 %vm230_vm2, %v529_v35 }
 0x361   :  { %1465 = vmatpush3.bf16.msra.mxu0 %v1464_v50  ;;  %1396 = vmatprep.mubr.msk.f32.mxu0 %vm1519_vm1, %v1518_v0  ;;  %v1139_v50 = vand.u32 127, %v1138_v49 }
 0x362   :  { %1466 = vmatprep.subr.bf16.mxu0 %v1520_v7 }
 0x365   :  { %1468 = vmatpush3.bf16.msra.mxu0 %v1467_v54 }
 0x366   :  { %1475 = vmatprep.subr.bf16.mxu0 %v1520_v7 }
 0x368   :  { %1397 = vmatmul.mubr.msk.f32.vlgmr.msra.gmra.mrb[10].mxu0 %vm230_vm2, %v529_v35  ;;  %v1228_v35 = vld [vmem:[%s1927_s5 + $0x9] ss:$0 sm:$0xff] }
 0x369   :  { %1418 = vmatprep.mubr.msk.f32.mxu0 %vm1519_vm1, %v1518_v0  ;;  %1477 = vmatpush3.bf16.msra.mxu0 %v1476_v6 }
 0x36a   :  { %1478 = vmatprep.subr.bf16.mxu0 %v1520_v7 }
 0x36d   :  { %1480 = vmatpush3.bf16.msra.mxu0 %v1479_v9 }
 0x390   :  { %v713_v55 = vpop.f32.mrb[12].mxu1 }
 0x391   :  { %v1365_v56 = vpop.f32.mrb[13].mxu1 }
 0x398   :  { %v869_v57 = vpop.f32.mrb[14].mxu1 }
 0x399   :  { %v1387_v58 = vpop.f32.mrb[15].mxu1 }
 0x3a0   :  { %v1029_v59 = vpop.f32.mrb[16].mxu1 }
 0x3a1   :  { %v1409_v60 = vpop.f32.mrb[17].mxu1  ;;  %v1030_v24 = vadd.f32 %v1226_v21, %v1029_v59 }
 0x42b   :  { %v638_v38 = vpop.f32.mrb[6].mxu0 }
 0x42c   :  { %v639_v39 = vadd.f32 %v1214_v10, %v638_v38  ;;  %v1354_v43 = vpop.f32.mrb[7].mxu0 }
 0x42e   :  { %v717_v42 = vadd.f32 %v713_v55, %v639_v39 }
 0x430   :  { %v722_v44 = vadd.f32 %v1217_v41, %v717_v42 }
 0x432   :  { %v1218_v53 = vmul.f32 -1.442695, %v722_v44 }
 0x433   :  { %v799_v7 = vpop.f32.mrb[8].mxu0 }
 0x434   :  { %1502 = vpow2.f32 %v1218_v53  ;;  %v800_v11 = vadd.f32 %v1219_v48, %v799_v7  ;;  %v1376_v40 = vpop.f32.mrb[9].mxu0 }
 0x436   :  { %v873_v12 = vadd.f32 %v869_v57, %v800_v11 }
 0x438   :  { %v878_v13 = vadd.f32 %v1222_v45, %v873_v12 }
 0x43a   :  { %v1223_v14 = vmul.f32 -1.442695, %v878_v13 }
 0x43b   :  { %v955_v15 = vpop.f32.mrb[10].mxu0 }
 0x43c   :  { %1504 = vpow2.f32 %v1223_v14  ;;  %v1398_v17 = vpop.f32.mrb[11].mxu0  ;;  %v956_v27 = vadd.f32 %v1224_v23, %v955_v15 }
 0x43e   :  { %v1503_v18 = vpop.eup %1502 }
 0x43f   :  { %v726_v19 = vadd.f32 1.0, %v1503_v18 }
 0x441   :  { %1506 = vrcp.f32 %v726_v19 }
 0x446   :  { %v1505_v20 = vpop.eup %1504 }
 0x447   :  { %v882_v22 = vadd.f32 1.0, %v1505_v20 }
 0x449   :  { %1508 = vrcp.f32 %v882_v22 }
 0x44b   :  { %v1507_v25 = vpop.eup %1506 }
 0x44c   :  { %v1033_v26 = vmul.f32 %v1507_v25, %v1030_v24 }
 0x44e   :  { %v1034_v28 = vadd.f32 %v1033_v26, %v956_v27 }
 0x450   :  { %1510 = vtanh.f32 %v1034_v28 }
 0x453   :  { %v1509_v29 = vpop.eup %1508 }
 0x454   :  { %v1036_v30 = vsub.f32 1.0, %v1509_v29  ;;  %v1039_v33 = vmul.f32 %v1509_v29, %v1767_v16 }
 0x45a   :  { %v1511_v31 = vpop.eup %1510 }
 0x45b   :  { %v1037_v32 = vmul.f32 %v1511_v31, %v1036_v30 }
 0x45d   :  { %v1040_v34 = vadd.f32 %v1039_v33, %v1037_v32 }
 0x45f   :  { %1419 = vmatmul.mubr.msk.f32.vlgmr.msra.gmra.mrb[12].mxu0 %vm230_vm2, %v1040_v34 }
 0x532   :  { %v1119_v36 = vpop.f32.mrb[12].mxu0 }
 0x533   :  { %v1120_v47 = vadd.f32 %v1228_v35, %v1119_v36  ;;  %v1420_v37 = vpop.f32.mrb[13].mxu0 }
 0x535   :  { %v1124_v46 = vsel %vm1123_vm3, %v1120_v47, -inf }
 0x536   :  { %1125 = vmax.xlane.f32.xlu1 %v1124_v46 }
 0x5c3   :  { %v1126_v51 = vpop.xlane.xlu1 %1125 }
 0x5c4   :  { %v1127_v52 = vsub.f32 %v1120_v47, %v1126_v51  ;;  %vm1140_vm4 = vcmp.ge.f32.partialorder %v1120_v47, %v1126_v51 }
 0x5c5   :  { %v1141_v16 = vsel %vm1140_vm4, %v1139_v50, 5 }
 0x5c6   :  { %v1128_v54 = vmul.f32 1.442695, %v1127_v52  ;;  %v1142_v55 = vsel %vm1123_vm3, %v1141_v16, 2147483647 }
 0x5c7   :  { %v1144_v56 = vshra.s32 %v1142_v55, 16  ;;  %v1143_v60 = vand.u32 65535, %v1142_v55 }
 0x5c8   :  { %1512 = vpow2.f32 %v1128_v54 }
 0x5c9   :  { %v1146_v57 = vcvt.s32.f32 %v1144_v56  ;;  %v1145_v4 = vcvt.s32.f32 %v1143_v60 }
 0x5cb   :  { %1147 = vmin.xlane.f32.xlu0 %v1146_v57 }
 0x5d2   :  { %v1513_v58 = vpop.eup %1512 }
 0x5d3   :  { %v1130_v59 = vsel %vm1123_vm3, %v1513_v58, 0.0 }
 0x5d4   :  { %1131 = vadd.xlane.f32.xlu1 %v1130_v59 }
 0x658   :  { %v1148_v3 = vpop.xlane.xlu0 %1147 }
 0x659   :  { %vm1149_vm5 = vcmp.eq.f32.partialorder %v1146_v57, %v1148_v3  ;;  %v1154_v42 = vcvt.f32.s32 %v1148_v3 }
 0x65a   :  { %v1150_v5 = vsel %vm1149_vm5, %v1145_v4, inf }
 0x65b   :  { %1151 = vmin.xlane.f32.xlu0 %v1150_v5  ;;  %v1155_v48 = vshll.u32 %v1154_v42, 16 }
 0x661   :  { %v1132_v6 = vpop.xlane.xlu1 %1131 }
 0x662   :  { %1514 = vlog2.f32 %v1132_v6 }
 0x66c   :  { %v1515_v8 = vpop.eup %1514 }
 0x66d   :  { %v1134_v9 = vmul.f32 0.6931472, %v1515_v8 }
 0x66f   :  { %v1135_v10 = vsub.f32 %v1127_v52, %v1134_v9 }
 0x671   :  { %v1136_v38 = vmul.f32 1.442695, %v1135_v10 }
 0x673   :  { %1516 = vpow2.f32 %v1136_v38 }
 0x67d   :  { %v1517_v39 = vpop.eup %1516 }
 0x67e   :  { %v1164_v43 = vmul.f32 %v1517_v39, %v1135_v10 }
 0x680   :  { %v1165_v41 = vsel %vm1123_vm3, %v1164_v43, 0.0 }
 0x681   :  { %1166 = vadd.xlane.f32.xlu1 %v1165_v41 }
 0x692   :  { %1171 = vrot.lane.b32.xlu1 %v1120_v47, %s1523_s29 }
 0x6e8   :  { %v1152_v44 = vpop.xlane.xlu0 %1151 }
 0x6e9   :  { %v1153_v53 = vcvt.f32.s32 %v1152_v44 }
 0x6eb   :  { %v1156_v7 = vadd.s32 %v1155_v48, %v1153_v53 }
 0x6ed   :  { %vm1157_vm6 = vcmp.eq.s32.totalorder %v1139_v50, %v1156_v7  ;;  %v1176_v13 = vcvt.s32.f32 %v1156_v7 }
 0x6ee   :  { %v1230_v11 = vsel %vm1157_vm6, 1.0, %v1518_v0 }
 0x6ef   :  { %v1160_v40 = vmul.f32 %v1230_v11, %v1135_v10 }
 0x6f1   :  { %v1161_v45 = vsel %vm1123_vm3, %v1160_v40, 0.0 }
 0x6f2   :  { %1162 = vadd.xlane.f32.xlu0 %v1161_v45 }
 0x708   :  { %1193 = vrot.lane.b32.xlu0 %v1040_v34, %s1524_s30 }
 0x70e   :  { %v1167_v12 = vpop.xlane.xlu1 %1166 }
 0x70f   :  { %v1168_v0 = vsub.f32 0.0, %v1167_v12 }
 0x712   :  { %v1172_v14 = vpop.permute.xlu1 %1171 }
 0x713   :  { %1175 = vst.msk [vmem:[%s1929_s6] sm:$0xff] %vm1174_vm7, %v1172_v14 }
 0x714   :  { %1178 = vst.msk [vmem:[%s1929_s6] sm:$0xff] %vm1177_vm8, %v1176_v13 }
 0x77f   :  { %v1163_v15 = vpop.xlane.xlu0 %1162 }
 0x780   :  { %1180 = vst.msk [vmem:[%s1929_s6] sm:$0xff] %vm1179_vm9, %v1163_v15 }
 0x781   :  { %1182 = vst.msk [vmem:[%s1929_s6] sm:$0xff] %vm1181_vm10, %v1168_v0 }
 0x782   :  { %1184 = vst.msk [vmem:[%s1929_s6] sm:$0xff] %vm1183_vm11, %v1717_v62 }
 0x783   :  { %1186 = vst.msk [vmem:[%s1929_s6] sm:$0xff] %vm1185_vm12, %v1719_v63  ;;  %v1194_v17 = vpop.permute.xlu0 %1193 }
 0x784   :  { %1188 = vst.msk [vmem:[%s1929_s6] sm:$0xff] %vm1187_vm13, %v1721_v2 }
 0x785   :  { %1190 = vst.msk [vmem:[%s1929_s6] sm:$0xff] %vm1189_vm14, %v1715_v61 }
 0x786   :  { %1192 = vst.msk [vmem:[%s1929_s6] sm:$0xff] %vm1191_vm15, %v1723_v1 }
 0x787   :  { %1197 = vst.msk [vmem:[%s1929_s6] sm:$0xff] %vm1196_vm0, %v1194_v17 }

</bundles_post_ra>
